<compile_context>
chip_gen: v6e
topology: v6e:2x2x1
jax: 0.10.0
libtpu: 0.0.40
codegen_flags: <defaults>
</compile_context>

<pallas_src>
import functools

import jax
import jax.numpy as jnp
from jax.experimental import pallas as pl
from jax.experimental.pallas import tpu as pltpu


def gaussian_variable_kernel(x_ref, eps_ref,
                             wml_ref, bml_ref,
                             w1_ref, b1_ref,
                             w2_ref, b2_ref,
                             out_ref, *, latent_dim, pad_lanes):
    L = latent_dim
    x = x_ref[...]

    # Fused posterior projection: one [TILE_B, in] @ [in, 2L] matmul -> mean | logv.
    ml = (jnp.dot(x, wml_ref[...], preferred_element_type=jnp.float32)
          + bml_ref[...].astype(jnp.float32))

    # reparameterize(mean, logv, is_logv=True): sigma = exp(0.5*logv)  (EUP slot)
    mean = ml[:, :L]
    logv = ml[:, L:]
    z = mean + eps_ref[...].astype(jnp.float32) * jnp.exp(0.5 * logv)

    # rec = Tanh(Linear(ReLU(Linear(z))))
    wdt = w1_ref.dtype
    h = (jnp.dot(z.astype(wdt), w1_ref[...], preferred_element_type=jnp.float32)
         + b1_ref[...].astype(jnp.float32))
    h = jnp.maximum(h, 0.0)
    rec = jnp.tanh(
        jnp.dot(h.astype(w2_ref.dtype), w2_ref[...], preferred_element_type=jnp.float32)
        + b2_ref[...].astype(jnp.float32))

    # Single lane-dense packed store: ml(=mean|logv) | z | rec | zero-pad.
    parts = [ml, z, rec]
    if pad_lanes:
        parts.append(jnp.zeros((x.shape[0], pad_lanes), jnp.float32))
    out_ref[...] = jnp.concatenate(parts, axis=-1).astype(out_ref.dtype)


def _round_up(n, m):
    return ((n + m - 1) // m) * m


def _pick_tile_b(batch):
    """Pick a large, sublane-aligned batch tile.

    Rows here are skinny (~a few hundred bytes), so the kernel is per-step
    overhead bound: prefer the fewest grid steps that still give the v7x
    megacore >= 2 balanced steps when the batch is big enough.
    """
    if batch < 8:
        return batch            # block dim equals full array dim -> allowed
    if batch <= 15:
        return 8
    # 2 balanced steps (megacore) unless that would exceed the 4096-row cap.
    tile = _round_up(pl.cdiv(batch, 2), 8)
    return min(tile, 4096)


def fuse_params(params):
    """Hoist the Wm|Wl / bm|bl fusion out of the per-call path (do this once)."""
    fused = dict(params)
    fused["wml"] = jnp.concatenate([params["wm"], params["wl"]], axis=1)  # [in, 2L]
    fused["bml"] = jnp.concatenate([params["bm"], params["bl"]], axis=1)  # [1, 2L]
    return fused


def gaussian_variable_forward(x, eps, params, *, tile_b=None, stream_dtype=None,
                              return_packed=False):
    """x: [B, input_dim], eps: [B, latent_dim].

    Returns dict(mean, logv, z, rec) by default, or (packed, offsets) with
    packed = [B, pad(3L+O, 128)] when return_packed=True (avoids the four
    wrapper-side output slices for downstream consumers that can take offsets).
    """
    B, input_dim = x.shape
    L = params["w1"].shape[0]          # latent_dim
    H = params["w1"].shape[1]          # latent_dim * 2
    O = params["w2"].shape[1]          # output_dim
    packed_dim = 3 * L + O
    padded_dim = _round_up(packed_dim, 128)    # lane-dense output slab
    pad_lanes = padded_dim - packed_dim

    # Fused projection weights (use the cached ones if present).
    if "wml" in params:
        wml, bml = params["wml"], params["bml"]
    else:
        wml = jnp.concatenate([params["wm"], params["wl"]], axis=1)
        bml = jnp.concatenate([params["bm"], params["bl"]], axis=1)
    w1, b1, w2, b2 = params["w1"], params["b1"], params["w2"], params["b2"]

    # Optional bf16 streaming of the HBM-traffic tensors (f32 accumulation kept).
    if stream_dtype is not None:
        x = x.astype(stream_dtype)
        eps = eps.astype(stream_dtype)
        wml = wml.astype(stream_dtype)
        w1 = w1.astype(stream_dtype)
        w2 = w2.astype(stream_dtype)

    if tile_b is None:
        tile_b = _pick_tile_b(B)
    grid_steps = pl.cdiv(B, tile_b)
    grid = (grid_steps,)

    batch_map = lambda i: (i, 0)      # tiles along batch
    resident_map = lambda i: (0, 0)   # weights/biases stay VMEM-resident

    rows = grid_steps * tile_b
    flops = 2 * rows * (input_dim * 2 * L + L * H + H * O)
    transcendentals = rows * (L + O)
    in_bytes = x.dtype.itemsize
    bytes_accessed = (
        rows * in_bytes * (input_dim + L)
        + rows * 4 * padded_dim
        + in_bytes * (wml.size + w1.size + w2.size)
        + 4 * (bml.size + b1.size + b2.size)
    )

    # VMEM budget: double-buffered streamed tiles + resident weights, with headroom.
    stream_bytes = 2 * tile_b * (in_bytes * (input_dim + L) + 4 * padded_dim)
    weight_bytes = (in_bytes * (wml.size + w1.size + w2.size)
                    + 4 * (bml.size + b1.size + b2.size))
    vmem_limit = int(min(64 * 2**20,
                         max(16 * 2**20, 2 * (stream_bytes + weight_bytes) + (4 << 20))))

    packed = pl.pallas_call(
        functools.partial(gaussian_variable_kernel, latent_dim=L, pad_lanes=pad_lanes),
        out_shape=jax.ShapeDtypeStruct((B, padded_dim), jnp.float32),
        grid=grid,
        in_specs=[
            pl.BlockSpec((tile_b, input_dim), batch_map),   # x (streamed)
            pl.BlockSpec((tile_b, L), batch_map),           # eps (streamed)
            pl.BlockSpec(wml.shape, resident_map),          # Wm|Wl (resident)
            pl.BlockSpec(bml.shape, resident_map),          # bm|bl
            pl.BlockSpec(w1.shape, resident_map),
            pl.BlockSpec(b1.shape, resident_map),
            pl.BlockSpec(w2.shape, resident_map),
            pl.BlockSpec(b2.shape, resident_map),
        ],
        out_specs=pl.BlockSpec((tile_b, padded_dim), batch_map),
        compiler_params=pltpu.CompilerParams(
            dimension_semantics=("parallel",),
            vmem_limit_bytes=vmem_limit,
        ),
        cost_estimate=pl.CostEstimate(
            flops=flops,
            transcendentals=transcendentals,
            bytes_accessed=int(bytes_accessed),
        ),
    )(x, eps, wml, bml, w1, b1, w2, b2)

    offsets = {"mean": (0, L), "logv": (L, 2 * L), "z": (2 * L, 3 * L),
               "rec": (3 * L, 3 * L + O)}
    if return_packed:
        return packed, offsets
    # NOTE: these slices are wrapper-side XLA copies; prefer return_packed=True
    # in production to hand consumers the lane-dense slab + offsets directly.
    return {name: packed[:, lo:hi] for name, (lo, hi) in offsets.items()}


def init_params(key, input_dim, latent_dim, output_dim):
    """Deterministic synthetic init (mimics nn.Linear shapes); weights stored [in, out]."""
    ks = jax.random.split(key, 8)
    scale = 0.1

    def lin(kw, kb, fan_in, fan_out):
        w = scale * jax.random.normal(kw, (fan_in, fan_out), dtype=jnp.float32)
        b = scale * jax.random.normal(kb, (1, fan_out), dtype=jnp.float32)
        return w, b

    wm, bm = lin(ks[0], ks[1], input_dim, latent_dim)
    wl, bl = lin(ks[2], ks[3], input_dim, latent_dim)
    w1, b1 = lin(ks[4], ks[5], latent_dim, latent_dim * 2)
    w2, b2 = lin(ks[6], ks[7], latent_dim * 2, output_dim)
    return {"wm": wm, "bm": bm, "wl": wl, "bl": bl,
            "w1": w1, "b1": b1, "w2": w2, "b2": b2}


def reference_forward(x, eps, p):
    mean = x @ p["wm"] + p["bm"]
    logv = x @ p["wl"] + p["bl"]
    z = mean + eps * jnp.exp(0.5 * logv)
    h = jnp.maximum(z @ p["w1"] + p["b1"], 0.0)
    rec = jnp.tanh(h @ p["w2"] + p["b2"])
    return {"mean": mean, "logv": logv, "z": z, "rec": rec}


if __name__ == "__main__":
    key = jax.random.PRNGKey(0)
    k_param, k_x, k_eps = jax.random.split(key, 3)

    batch, input_dim, latent_dim, output_dim = 8, 32, 16, 32

    params = init_params(k_param, input_dim, latent_dim, output_dim)
    fused = fuse_params(params)   # done once, outside the per-call path

    x = jax.random.normal(k_x, (batch, input_dim), dtype=jnp.float32)
    # epsilon ~ N(0,1) drawn outside the kernel (torch.randn_like equivalent)
    eps = jax.random.normal(k_eps, (batch, latent_dim), dtype=jnp.float32)

    out = gaussian_variable_forward(x, eps, fused)
    jax.block_until_ready(out)

    ref = reference_forward(x, eps, params)
    for name in ("mean", "logv", "z", "rec"):
        assert out[name].shape == ref[name].shape, name
        assert jnp.allclose(out[name], ref[name], atol=1e-5, rtol=1e-5), name

    print("KERNEL_OK")
</pallas_src>

<mosaic_0001>
module attributes {stable_mosaic.version = 11 : i64} {
  func.func @gaussian_variable_kernel(%arg0: i32, %arg1: memref<8x32xf32, #tpu.memory_space<vmem>>, %arg2: memref<8x16xf32, #tpu.memory_space<vmem>>, %arg3: memref<32x32xf32, #tpu.memory_space<vmem>>, %arg4: memref<1x32xf32, #tpu.memory_space<vmem>>, %arg5: memref<16x32xf32, #tpu.memory_space<vmem>>, %arg6: memref<1x32xf32, #tpu.memory_space<vmem>>, %arg7: memref<32x32xf32, #tpu.memory_space<vmem>>, %arg8: memref<1x32xf32, #tpu.memory_space<vmem>>, %arg9: memref<8x128xf32, #tpu.memory_space<vmem>>) attributes {dimension_semantics = [#tpu.dimension_semantics<parallel>], iteration_bounds = array<i64: 1>, scalar_prefetch = 0 : i64, scratch_operands = 0 : i64, tpu.core_type = #tpu.core_type<tc>, window_params = [{transform_indices = @transform_0, window_bounds = array<i64: 8, 32>}, {transform_indices = @transform_1, window_bounds = array<i64: 8, 16>}, {pipeline_mode = #tpu.pipeline_mode<synchronous>, transform_indices = @transform_2, window_bounds = array<i64: 32, 32>}, {pipeline_mode = #tpu.pipeline_mode<synchronous>, transform_indices = @transform_3, window_bounds = array<i64: 1, 32>}, {pipeline_mode = #tpu.pipeline_mode<synchronous>, transform_indices = @transform_4, window_bounds = array<i64: 16, 32>}, {pipeline_mode = #tpu.pipeline_mode<synchronous>, transform_indices = @transform_5, window_bounds = array<i64: 1, 32>}, {pipeline_mode = #tpu.pipeline_mode<synchronous>, transform_indices = @transform_6, window_bounds = array<i64: 32, 32>}, {pipeline_mode = #tpu.pipeline_mode<synchronous>, transform_indices = @transform_7, window_bounds = array<i64: 1, 32>}, {transform_indices = @transform_8, window_bounds = array<i64: 8, 128>}]} {
    %c0 = arith.constant 0 : index
    %c0_0 = arith.constant 0 : index
    %0 = vector.load %arg1[%c0, %c0_0] : memref<8x32xf32, #tpu.memory_space<vmem>>, vector<8x32xf32>
    %c0_1 = arith.constant 0 : index
    %c0_2 = arith.constant 0 : index
    %1 = vector.load %arg3[%c0_1, %c0_2] : memref<32x32xf32, #tpu.memory_space<vmem>>, vector<32x32xf32>
    %cst = arith.constant dense<0.000000e+00> : vector<8x32xf32>
    %2 = tpu.matmul %0, %1, %cst {dimension_numbers = #tpu.dot_dimension_numbers<[1], [0], [0], [1], [0, 0, 1, 1], [], []>} : vector<8x32xf32>, vector<32x32xf32>, vector<8x32xf32> -> vector<8x32xf32>
    %c0_3 = arith.constant 0 : index
    %c0_4 = arith.constant 0 : index
    %3 = vector.load %arg4[%c0_3, %c0_4] : memref<1x32xf32, #tpu.memory_space<vmem>>, vector<1x32xf32>
    %4 = vector.broadcast %3 : vector<1x32xf32> to vector<8x32xf32>
    %5 = arith.addf %2, %4 : vector<8x32xf32>
    %6 = vector.extract_strided_slice %5 {offsets = [0, 0], sizes = [8, 16], strides = [1, 1]} : vector<8x32xf32> to vector<8x16xf32>
    %7 = vector.extract_strided_slice %5 {offsets = [0, 16], sizes = [8, 16], strides = [1, 1]} : vector<8x32xf32> to vector<8x16xf32>
    %c0_5 = arith.constant 0 : index
    %c0_6 = arith.constant 0 : index
    %8 = vector.load %arg2[%c0_5, %c0_6] : memref<8x16xf32, #tpu.memory_space<vmem>>, vector<8x16xf32>
    %cst_7 = arith.constant 5.000000e-01 : f32
    %9 = vector.broadcast %cst_7 : f32 to vector<8x16xf32>
    %10 = arith.mulf %9, %7 : vector<8x16xf32>
    %11 = math.exp %10 : vector<8x16xf32>
    %12 = arith.mulf %8, %11 : vector<8x16xf32>
    %13 = arith.addf %6, %12 : vector<8x16xf32>
    %c0_8 = arith.constant 0 : index
    %c0_9 = arith.constant 0 : index
    %14 = vector.load %arg5[%c0_8, %c0_9] : memref<16x32xf32, #tpu.memory_space<vmem>>, vector<16x32xf32>
    %cst_10 = arith.constant dense<0.000000e+00> : vector<8x32xf32>
    %15 = tpu.matmul %13, %14, %cst_10 {dimension_numbers = #tpu.dot_dimension_numbers<[1], [0], [0], [1], [0, 0, 1, 1], [], []>} : vector<8x16xf32>, vector<16x32xf32>, vector<8x32xf32> -> vector<8x32xf32>
    %c0_11 = arith.constant 0 : index
    %c0_12 = arith.constant 0 : index
    %16 = vector.load %arg6[%c0_11, %c0_12] : memref<1x32xf32, #tpu.memory_space<vmem>>, vector<1x32xf32>
    %17 = vector.broadcast %16 : vector<1x32xf32> to vector<8x32xf32>
    %18 = arith.addf %15, %17 : vector<8x32xf32>
    %cst_13 = arith.constant 0.000000e+00 : f32
    %19 = vector.broadcast %cst_13 : f32 to vector<8x32xf32>
    %20 = arith.maximumf %18, %19 : vector<8x32xf32>
    %c0_14 = arith.constant 0 : index
    %c0_15 = arith.constant 0 : index
    %21 = vector.load %arg7[%c0_14, %c0_15] : memref<32x32xf32, #tpu.memory_space<vmem>>, vector<32x32xf32>
    %cst_16 = arith.constant dense<0.000000e+00> : vector<8x32xf32>
    %22 = tpu.matmul %20, %21, %cst_16 {dimension_numbers = #tpu.dot_dimension_numbers<[1], [0], [0], [1], [0, 0, 1, 1], [], []>} : vector<8x32xf32>, vector<32x32xf32>, vector<8x32xf32> -> vector<8x32xf32>
    %c0_17 = arith.constant 0 : index
    %c0_18 = arith.constant 0 : index
    %23 = vector.load %arg8[%c0_17, %c0_18] : memref<1x32xf32, #tpu.memory_space<vmem>>, vector<1x32xf32>
    %24 = vector.broadcast %23 : vector<1x32xf32> to vector<8x32xf32>
    %25 = arith.addf %22, %24 : vector<8x32xf32>
    %26 = math.tanh %25 : vector<8x32xf32>
    %cst_19 = arith.constant 0.000000e+00 : f32
    %27 = vector.broadcast %cst_19 : f32 to vector<8x48xf32>
    %28 = tpu.concatenate %5, %13, %26, %27 in 1 : vector<8x32xf32>, vector<8x16xf32>, vector<8x32xf32>, vector<8x48xf32> -> vector<8x128xf32>
    %c0_20 = arith.constant 0 : index
    %c0_21 = arith.constant 0 : index
    %29 = vector.load %arg9[%c0_20, %c0_21] : memref<8x128xf32, #tpu.memory_space<vmem>>, vector<8x128xf32>
    tpu.vector_store %arg9[%c0_20, %c0_21], %28 {strides = array<i32>} : memref<8x128xf32, #tpu.memory_space<vmem>>, vector<8x128xf32>,
    return
  }
  func.func @transform_0(%arg0: i32) -> (i32, i32) {
    %c0_i32 = arith.constant 0 : i32
    %c0_i32_0 = arith.constant 0 : i32
    return %arg0, %c0_i32 : i32, i32
  }
  func.func @transform_1(%arg0: i32) -> (i32, i32) {
    %c0_i32 = arith.constant 0 : i32
    %c0_i32_0 = arith.constant 0 : i32
    return %arg0, %c0_i32 : i32, i32
  }
  func.func @transform_2(%arg0: i32) -> (i32, i32) {
    %c0_i32 = arith.constant 0 : i32
    %c0_i32_0 = arith.constant 0 : i32
    %c0_i32_1 = arith.constant 0 : i32
    return %c0_i32, %c0_i32_0 : i32, i32
  }
  func.func @transform_3(%arg0: i32) -> (i32, i32) {
    %c0_i32 = arith.constant 0 : i32
    %c0_i32_0 = arith.constant 0 : i32
    %c0_i32_1 = arith.constant 0 : i32
    return %c0_i32, %c0_i32_0 : i32, i32
  }
  func.func @transform_4(%arg0: i32) -> (i32, i32) {
    %c0_i32 = arith.constant 0 : i32
    %c0_i32_0 = arith.constant 0 : i32
    %c0_i32_1 = arith.constant 0 : i32
    return %c0_i32, %c0_i32_0 : i32, i32
  }
  func.func @transform_5(%arg0: i32) -> (i32, i32) {
    %c0_i32 = arith.constant 0 : i32
    %c0_i32_0 = arith.constant 0 : i32
    %c0_i32_1 = arith.constant 0 : i32
    return %c0_i32, %c0_i32_0 : i32, i32
  }
  func.func @transform_6(%arg0: i32) -> (i32, i32) {
    %c0_i32 = arith.constant 0 : i32
    %c0_i32_0 = arith.constant 0 : i32
    %c0_i32_1 = arith.constant 0 : i32
    return %c0_i32, %c0_i32_0 : i32, i32
  }
  func.func @transform_7(%arg0: i32) -> (i32, i32) {
    %c0_i32 = arith.constant 0 : i32
    %c0_i32_0 = arith.constant 0 : i32
    %c0_i32_1 = arith.constant 0 : i32
    return %c0_i32, %c0_i32_0 : i32, i32
  }
  func.func @transform_8(%arg0: i32) -> (i32, i32) {
    %c0_i32 = arith.constant 0 : i32
    %c0_i32_0 = arith.constant 0 : i32
    return %arg0, %c0_i32 : i32, i32
  }
}

</mosaic_0001>

<bundles_post_ra>
// kernel: tpu_custom_call.1
= control target key start
LH: loop header
LB: loop body
LE: loop exit
PB: predicated region body
PF: predicated region fallthrough
CT: control target
= control target key end

     0   :  { %13 = vsyncpa [#allocation3], 0  ;;  %s682_s0 = inlined_call_operand.hbm [shape: f32[8,32], index: 0, kind: input, shape index: {}]   ;;  %s683_s1 = inlined_call_operand.hbm [shape: f32[8,16], index: 1, kind: input, shape index: {}]   ;;  %s684_s2 = inlined_call_operand.hbm [shape: f32[32,32], index: 2, kind: input, shape index: {}]   ;;  %s685_s3 = inlined_call_operand.vmem [shape: f32[1,32], index: 3, kind: input, shape index: {}]   ;;  %s686_s4 = inlined_call_operand.hbm [shape: f32[16,32], index: 4, kind: input, shape index: {}]   ;;  %s687_s5 = inlined_call_operand.vmem [shape: f32[1,32], index: 5, kind: input, shape index: {}]   ;;  %s688_s6 = inlined_call_operand.hbm [shape: f32[32,32], index: 6, kind: input, shape index: {}]   ;;  %s689_s7 = inlined_call_operand.vmem [shape: f32[1,32], index: 7, kind: input, shape index: {}]   ;;  %s690_s8 = inlined_call_operand.hbm [shape: f32[8,128], index: 8, kind: output, shape index: {}]  }
   0x1   :  { %14 = vsyncpa [#allocation6], 0 }
   0x2   :  { %15 = vsyncpa [#allocation9], 0 }
   0x3   :  { %16 = vsyncpa [#allocation4], 0  ;;  %s582_s27 = smov [#allocation5]  }
   0x4   :  { %s33_s28 = sshll.u32 %s582_s27, 4  ;;  %s34_s28 = int_to_ptr.vmem [resolvable:$true] %s33_s28 }
   0x5   :  { %s462_s29 = scalar_lea.vmem %s34_s28, 128  ;;  %p467_p1 = scmp.lt.s32.totalorder %s34_s28, %s34_s28 }
   0x6   :  { %p463_p0 = scmp.ne.s32.totalorder %s34_s28, %s462_s29  ;;  %p468_p2 = scmp.lt.s32.totalorder %s462_s29, %s462_s29 }
   0x8   :  { %p469_p3 = por %p468_p2, %p467_p1 }
   0xa   :  { %p470_p4 = pnand %p469_p3, %p463_p0 }
   0xc   :  { %473 = shalt.err (!%p470_p4)
}
   0xd   :  { %36 = dma.hbm_to_vmem [thread:$0]  %s683_s1, 128, %s34_s28, [#allocation6]  }
   0xe   :  { %s583_s10 = smov [#allocation8]   ;;  %s584_s12 = smov [#allocation2]  }
   0xf   :  { %s56_s11 = sshll.u32 %s583_s10, 4  ;;  %s23_s13 = sshll.u32 %s584_s12, 4  ;;  %s57_s11 = int_to_ptr.vmem [resolvable:$true] %s56_s11  ;;  %s24_s13 = int_to_ptr.vmem [resolvable:$true] %s23_s13 }
  0x10   :  { %s482_s14 = scalar_lea.vmem %s57_s11, 256  ;;  %p487_p6 = scmp.lt.s32.totalorder %s57_s11, %s57_s11 }
  0x11   :  { %p483_p5 = scmp.ne.s32.totalorder %s57_s11, %s482_s14  ;;  %p488_p7 = scmp.lt.s32.totalorder %s482_s14, %s482_s14 }
  0x13   :  { %p489_p8 = por %p488_p7, %p487_p6 }
  0x15   :  { %p490_p9 = pnand %p489_p8, %p483_p5 }
  0x17   :  { %493 = shalt.err (!%p490_p9)
}
  0x18   :  { %s585_s15 = smov 128   ;;  %s586_s16 = smov 8  }
  0x19   :  { %62 = dma.hbm_to_vmem [thread:$0]  %s686_s4, 256, %s57_s11, [#allocation9], %s585_s15, %s585_s15, %s586_s16  }
  0x1a   :  { %s502_s1 = scalar_lea.vmem %s24_s13, 128  ;;  %p507_p11 = scmp.lt.s32.totalorder %s24_s13, %s24_s13 }
  0x1b   :  { %p503_p10 = scmp.ne.s32.totalorder %s24_s13, %s502_s1  ;;  %p508_p12 = scmp.lt.s32.totalorder %s502_s1, %s502_s1 }
  0x1d   :  { %p509_p13 = por %p508_p12, %p507_p11 }
  0x1f   :  { %p510_p0 = pnand %p509_p13, %p503_p10 }
  0x21   :  { %513 = shalt.err (!%p510_p0)
}
  0x22   :  { %26 = dma.hbm_to_vmem [thread:$0]  %s682_s0, 128, %s24_s13, [#allocation3]  }
  0x23   :  { %s587_s21 = smov [#allocation7]   ;;  %s588_s23 = smov [#allocation10]  }
  0x24   :  { %s42_s22 = sshll.u32 %s587_s21, 4  ;;  %s70_s24 = sshll.u32 %s588_s23, 4  ;;  %s43_s22 = int_to_ptr.vmem [resolvable:$true] %s42_s22  ;;  %s71_s24 = int_to_ptr.vmem [resolvable:$true] %s70_s24 }
  0x25   :  { %s522_s25 = scalar_lea.vmem %s43_s22, 512  ;;  %p527_p2 = scmp.lt.s32.totalorder %s43_s22, %s43_s22 }
  0x26   :  { %p523_p1 = scmp.ne.s32.totalorder %s43_s22, %s522_s25  ;;  %p528_p3 = scmp.lt.s32.totalorder %s522_s25, %s522_s25 }
  0x28   :  { %p529_p4 = por %p528_p3, %p527_p2 }
  0x2a   :  { %p530_p5 = pnand %p529_p4, %p523_p1 }
  0x2c   :  { %533 = shalt.err (!%p530_p5)
}
  0x2d   :  { %48 = dma.hbm_to_vmem [thread:$0]  %s684_s2, 512, %s43_s22, [#allocation6], %s585_s15, %s585_s15, %s586_s16  }
  0x2e   :  { %s542_s0 = scalar_lea.vmem %s71_s24, 512  ;;  %p547_p7 = scmp.lt.s32.totalorder %s71_s24, %s71_s24 }
  0x2f   :  { %p543_p6 = scmp.ne.s32.totalorder %s71_s24, %s542_s0  ;;  %p548_p8 = scmp.lt.s32.totalorder %s542_s0, %s542_s0 }
  0x31   :  { %p549_p9 = por %p548_p8, %p547_p7 }
  0x33   :  { %p550_p10 = pnand %p549_p9, %p543_p6 }
  0x35   :  { %553 = shalt.err (!%p550_p10)
}
  0x36   :  { %76 = dma.hbm_to_vmem [thread:$0]  %s688_s6, 512, %s71_s24, [#allocation9], %s585_s15, %s585_s15, %s586_s16  }
  0x37   :  { %574 = dma.done.wait [#allocation3], 128  }
  0x38   :  { %575 = vsyncadd [#allocation3], 4294967168 }
  0x39   :  { %576 = dma.done.wait [#allocation6], 640  }
  0x3a   :  { %577 = vsyncadd [#allocation6], 4294966656 }
  0x3b   :  { %578 = dma.done.wait [#allocation9], 768  }
  0x3c   :  { %579 = vsyncadd [#allocation9], 4294966528  ;;  %v589_v0 = vmov 0.0   ;;  %vm590_vm0 = vmmov 0   ;;  %v98_v1 = vld [vmem:[#allocation7 + $0x18] sm:$0xff]  ;;  %v97_v2 = vld [vmem:[#allocation7 + $0x10] sm:$0xff] }
  0x3d   :  { %408 = vmatprep.subr.mxu0 %v589_v0  ;;  %416 = vmatprep.mubr.msk.f32.mxu0 %vm590_vm0, %v589_v0  ;;  %v96_v3 = vld [vmem:[#allocation7 + $0x8] sm:$0xff]  ;;  %v95_v4 = vld [vmem:[#allocation7] sm:$0xff]  ;;  %v94_v5 = vld [vmem:[#allocation2] sm:$0xff]  ;;  %vm106_vm1 = vcmask 261120   ;;  %s591_s29 = smov 112   ;;  %vm199_vm2 = vcmask 130048  }
  0x3e   :  { %419 = vmatprep.subr.mxu1 %v589_v0  ;;  %423 = vmatprep.mubr.msk.f32.mxu1 %vm590_vm0, %v589_v0  ;;  %v389_v6 = vld [vmem:[%s685_s3] ss:$0 sm:$0xff]  ;;  %v191_v12 = vld [vmem:[#allocation8 + $0x8] sm:$0xff]  ;;  %v190_v13 = vld [vmem:[#allocation8] sm:$0xff]  ;;  %s592_s3 = smov 32   ;;  %s593_s12 = smov 48  }
  0x3f   :  { %409 = vmatpush3.msra.mxu0 %v98_v1  ;;  %420 = vmatpush3.msra.mxu1 %v191_v12  ;;  %v180_v15 = vld [vmem:[#allocation5] sm:$0xff]  ;;  %v277_v19 = vld [vmem:[#allocation10 + $0x18] sm:$0xff]  ;;  %v276_v20 = vld [vmem:[#allocation10 + $0x10] sm:$0xff]  ;;  %vm367_vm3 = vcmask 392192   ;;  %vm369_vm4 = vcmask 654336  }
  0x40   :  { %410 = vmatprep.subr.mxu0 %v589_v0  ;;  %421 = vmatprep.subr.mxu1 %v589_v0  ;;  %v275_v21 = vld [vmem:[#allocation10 + $0x8] sm:$0xff]  ;;  %v274_v22 = vld [vmem:[#allocation10] sm:$0xff] }
  0x41   :  { %411 = vmatpush3.msra.mxu0 %v97_v2  ;;  %422 = vmatpush3.msra.mxu1 %v190_v13  ;;  %v391_v23 = vld [vmem:[%s687_s5] ss:$0 sm:$0xff]  ;;  %s594_s5 = smov [#allocation11]  }
  0x42   :  { %412 = vmatprep.subr.mxu0 %v589_v0  ;;  %426 = vmatprep.subr.mxu1 %v589_v0  ;;  %v393_v28 = vld [vmem:[%s689_s7] ss:$0 sm:$0xff]  ;;  %s378_s13 = sshll.u32 %s594_s5, 4  ;;  %s379_s13 = int_to_ptr.vmem [resolvable:$true] %s378_s13 }
  0x43   :  { %413 = vmatpush3.msra.mxu0 %v96_v3  ;;  %s554_s7 = scalar_lea.vmem %s379_s13, 128  ;;  %p559_p12 = scmp.lt.s32.totalorder %s379_s13, %s379_s13 }
  0x44   :  { %414 = vmatprep.subr.mxu0 %v589_v0  ;;  %p555_p11 = scmp.ne.s32.totalorder %s379_s13, %s554_s7  ;;  %p560_p13 = scmp.lt.s32.totalorder %s554_s7, %s554_s7 }
  0x45   :  { %415 = vmatpush3.msra.mxu0 %v95_v4 }
  0x46   :  { %417 = vmatmul.mubr.msk.f32.vlgmr.msra.gmra.mxu0 %vm106_vm1, %v94_v5  ;;  %p561_p0 = por %p560_p13, %p559_p12 }
  0x48   :  { %p562_p1 = pnand %p561_p0, %p555_p11 }
 0x106   :  { %v176_v7 = vpop.f32.mrf.mxu0 }
 0x107   :  { %v177_v8 = vadd.f32 %v389_v6, %v176_v7 }
 0x108   :  { %v418_v9 = vpop.f32.mrf.mxu0 }
 0x109   :  { %v181_v10 = vmul.f32 0.5, %v177_v8 }
 0x10b   :  { %v182_v11 = vmul.f32 1.442695, %v181_v10 }
 0x10d   :  { %450 = vpow2.f32 %v182_v11 }
 0x11a   :  { %v451_v14 = vpop.eup %450 }
 0x11b   :  { %185 = vrot.lane.b32.xlu0 %v451_v14, %s591_s29 }
 0x18d   :  { %v186_v16 = vpop.permute.xlu0 %185 }
 0x18e   :  { %v188_v17 = vmul.f32 %v186_v16, %v180_v15 }
 0x190   :  { %v189_v18 = vadd.f32 %v188_v17, %v177_v8 }
 0x192   :  { %359 = vrot.lane.b32.xlu0 %v189_v18, %s592_s3  ;;  %424 = vmatmul.mubr.msk.f32.vlgmr.msra.gmra.mxu1 %vm199_vm2, %v189_v18 }
 0x193   :  { %427 = vmatpush3.msra.mxu1 %v277_v19  ;;  %434 = vmatprep.mubr.msk.f32.mxu1 %vm590_vm0, %v589_v0 }
 0x194   :  { %428 = vmatprep.subr.mxu1 %v589_v0 }
 0x195   :  { %429 = vmatpush3.msra.mxu1 %v276_v20 }
 0x196   :  { %430 = vmatprep.subr.mxu1 %v589_v0 }
 0x197   :  { %431 = vmatpush3.msra.mxu1 %v275_v21 }
 0x198   :  { %432 = vmatprep.subr.mxu1 %v589_v0 }
 0x199   :  { %433 = vmatpush3.msra.mxu1 %v274_v22 }
 0x204   :  { %v360_v33 = vpop.permute.xlu0 %359 }
 0x205   :  { %v366_v34 = vsel %vm106_vm1, %v177_v8, %v360_v33 }
 0x252   :  { %v269_v24 = vpop.f32.mrf.mxu1 }
 0x253   :  { %v270_v25 = vadd.f32 %v391_v23, %v269_v24 }
 0x254   :  { %v425_v26 = vpop.f32.mrf.mxu1 }
 0x255   :  { %v273_v27 = vmax.f32 %v270_v25, 0.0 }
 0x257   :  { %435 = vmatmul.mubr.msk.f32.vlgmr.msra.gmra.mxu1 %vm106_vm1, %v273_v27 }
 0x317   :  { %v354_v29 = vpop.f32.mrf.mxu1 }
 0x318   :  { %v355_v30 = vadd.f32 %v393_v28, %v354_v29 }
 0x319   :  { %v436_v31 = vpop.f32.mrf.mxu1 }
 0x31a   :  { %452 = vtanh.f32 %v355_v30 }
 0x327   :  { %v453_v32 = vpop.eup %452 }
 0x328   :  { %363 = vrot.lane.b32.xlu1 %v453_v32, %s593_s12 }
 0x39a   :  { %v364_v35 = vpop.permute.xlu1 %363 }
 0x39b   :  { %v368_v36 = vsel %vm367_vm3, %v366_v34, %v364_v35 }
 0x39c   :  { %v370_v37 = vsel %vm369_vm4, %v368_v36, 0.0 }
 0x39d   :  { %371 = vst [vmem:[#allocation11] sm:$0xff] %v370_v37 }
 0x39e   :  { %565 = shalt.err (!%p562_p1)
}
 0x39f   :  { %381 = dma.vmem_to_hbm [thread:$0]  %s379_s13, 128, %s690_s8, [#allocation4]  }
 0x3a0   :  { %580 = dma.done.wait [#allocation4], 128  }
 0x3a1   :  { %581 = vsyncadd [#allocation4], 4294967168 }
 0x3a2   :  { %385 = vsyncpa [#allocation3], 1 }
 0x3a3   :  { %386 = vsyncpa [#allocation6], 1 }
 0x3a4   :  { %387 = vsyncpa [#allocation9], 1 }
 0x3a5   :  { %388 = vsyncpa [#allocation4], 1 }

</bundles_post_ra>
